<compile_context>
chip_gen: v7x
topology: tpu7x:2x2x1
jax: 0.10.0
libtpu: 0.0.40
codegen_flags: <defaults>
</compile_context>

<pallas_src>
import functools

import jax
import jax.numpy as jnp
from jax import lax
from jax.experimental import pallas as pl
from jax.experimental.pallas import tpu as pltpu


def _cdiv(a, b):
    return -(-a // b)


def _round_up(a, b):
    return _cdiv(a, b) * b


def _conv_act_kernel(xf_ref, w_ref, b_ref, o_ref, *, phases, slope):
    """One (batch, M-tile) output block per grid step.

    xf_ref : (P, TM, KF*Cin)    bf16  tap-folded, phase-decomposed patches
    w_ref  : (P, KF*Cin, Coutp) bf16  per-phase folded conv weights (constant block)
    b_ref  : (1, Coutp)         f32   bias (constant block)
    o_ref  : (TM, Coutp)        bf16  output rows
    """
    # One MXU matmul per stride phase, chained f32 accumulation.
    acc = jnp.dot(xf_ref[0], w_ref[0], preferred_element_type=jnp.float32)
    for p in range(1, phases):
        acc = acc + jnp.dot(xf_ref[p], w_ref[p],
                            preferred_element_type=jnp.float32)
    acc = acc + b_ref[...]                                   # bias in f32
    o_ref[...] = jnp.where(acc >= 0.0, acc, slope * acc).astype(o_ref.dtype)


def downscale_pallas(x_nchw, weight, bias, *, stride=2, act_slope=0.1,
                     tile_m=256, lane=128, out_dtype=jnp.bfloat16):
    """Conv2d(in_ch, out_ch, k, stride, padding=k//2) + LeakyReLU, fused in Pallas.

    x_nchw : (N, Cin, H, W)
    weight : (Cout, Cin, KH, KW)   (PyTorch conv weight layout)
    bias   : (Cout,)
    returns: (N, Cout, Ho, Wo) float32
    """
    n, cin, h, w = x_nchw.shape
    cout, cin_w, kh, kw = weight.shape
    assert cin == cin_w and stride >= 1
    s = stride
    pad_h = max(kh // 2, 0)
    pad_w = max(kw // 2, 0)
    ho = (h + 2 * pad_h - kh) // s + 1
    wo = (w + 2 * pad_w - kw) // s + 1
    assert ho >= 1 and wo >= 1

    P = s * s                       # number of stride phases
    qi_n = _cdiv(kh, s)             # taps per phase along H
    qj_n = _cdiv(kw, s)             # taps per phase along W
    kf = qi_n * qj_n                # taps folded into the contraction dim
    kfc = kf * cin                  # folded contraction size
    coutp = _round_up(cout, lane)   # lane-dense output width

    # ---- M-tile geometry (output rows = Ho*Wo, padded to a multiple of TM) ----
    m = ho * wo
    tm = _round_up(min(tile_m, m), 16)      # multiple of 16 for bf16 sublane packing
    m_pad = _round_up(m, tm)
    m_tiles = m_pad // tm

    # ---- layout pass: phase decomposition + tap fold (plain XLA, fused) ----
    hq = max(ho + qi_n - 1, _cdiv(h + pad_h, s))
    wq = max(wo + qj_n - 1, _cdiv(w + pad_w, s))
    x_nhwc = jnp.transpose(x_nchw, (0, 2, 3, 1))
    xp = jnp.pad(
        x_nhwc,
        ((0, 0),
         (pad_h, s * hq - h - pad_h),
         (pad_w, s * wq - w - pad_w),
         (0, 0)))
    # (N, s*Hq, s*Wq, Cin) -> (N, ri, rj, Hq, Wq, Cin): xs[n,ri,rj,y,x,c] = xp[n, s*y+ri, s*x+rj, c]
    xs = xp.reshape(n, hq, s, wq, s, cin)
    xs = jnp.transpose(xs, (0, 2, 4, 1, 3, 5))
    # fold the per-phase taps (qi, qj) into the channel/lane dim
    taps = [xs[:, :, :, qi:qi + ho, qj:qj + wo, :]
            for qi in range(qi_n) for qj in range(qj_n)]
    xf = jnp.stack(taps, axis=5)                    # (N, s, s, Ho, Wo, KF, Cin)
    xf = xf.reshape(n, P, m, kfc)
    xf = jnp.pad(xf, ((0, 0), (0, 0), (0, m_pad - m), (0, 0))).astype(jnp.bfloat16)

    # weights: (Cout, Cin, KH, KW) -> (P, KF*Cin, Coutp), invalid tap slots zeroed.
    w_p = jnp.pad(weight, ((0, 0), (0, 0), (0, s * qi_n - kh), (0, s * qj_n - kw)))
    w_p = w_p.reshape(cout, cin, qi_n, s, qj_n, s)
    w_fold = jnp.transpose(w_p, (3, 5, 2, 4, 1, 0))   # (ri, rj, qi, qj, Cin, Cout)
    w_fold = w_fold.reshape(P, kfc, cout)
    w_fold = jnp.pad(w_fold, ((0, 0), (0, 0), (0, coutp - cout))).astype(jnp.bfloat16)
    b_k = jnp.pad(bias, (0, coutp - cout)).reshape(1, coutp).astype(jnp.float32)

    kernel = functools.partial(_conv_act_kernel, phases=P, slope=act_slope)

    # ---- VMEM budget derived from actual block sizes (double-buffered) ----
    xf_block = P * tm * kfc * 2
    out_block = tm * coutp * 2
    w_bytes = P * kfc * coutp * 2 + coutp * 4
    need = 2 * (xf_block + out_block) + 2 * w_bytes
    vmem_limit = int(min(64 * 2 ** 20, max(32 * 2 ** 20, 4 * need)))

    cost = pl.CostEstimate(
        flops=2 * n * m_pad * P * kfc * coutp,
        transcendentals=0,
        bytes_accessed=int(xf.size) * 2 + int(w_fold.size) * 2
                       + int(b_k.size) * 4 + n * m_pad * coutp * 2,
    )

    out_flat = pl.pallas_call(
        kernel,
        out_shape=jax.ShapeDtypeStruct((n, m_pad, coutp), out_dtype),
        grid_spec=pltpu.PrefetchScalarGridSpec(
            num_scalar_prefetch=0,
            grid=(n, m_tiles),
            in_specs=[
                # one image's P phase slabs, M-tiled
                pl.BlockSpec((None, P, tm, kfc), lambda nb, mb: (nb, 0, mb, 0)),
                # invariant weight / bias: constant index map -> fetched once
                pl.BlockSpec((P, kfc, coutp), lambda nb, mb: (0, 0, 0)),
                pl.BlockSpec((1, coutp), lambda nb, mb: (0, 0)),
            ],
            out_specs=pl.BlockSpec((None, tm, coutp), lambda nb, mb: (nb, mb, 0)),
        ),
        compiler_params=pltpu.CompilerParams(
            dimension_semantics=("parallel", "parallel"),
            vmem_limit_bytes=vmem_limit,
        ),
        cost_estimate=cost,
    )(xf, w_fold, b_k)

    # drop row / Cout padding, return NCHW f32
    out = out_flat[:, :m, :cout].reshape(n, ho, wo, cout)
    return jnp.transpose(out, (0, 3, 1, 2)).astype(jnp.float32)


def downscale_reference(x_nchw, weight, bias, *, stride=2, act_slope=0.1):
    kh, kw = weight.shape[2], weight.shape[3]
    pad_h = max(kh // 2, 0)
    pad_w = max(kw // 2, 0)
    out = lax.conv_general_dilated(
        x_nchw.astype(jnp.float32),
        weight.astype(jnp.float32),
        window_strides=(stride, stride),
        padding=((pad_h, pad_h), (pad_w, pad_w)),
        dimension_numbers=("NCHW", "OIHW", "NCHW"),
    ) + bias.reshape(1, -1, 1, 1)
    return jnp.where(out >= 0, out, act_slope * out)


if __name__ == "__main__":
    # Small shapes consistent with the module: batch=2, in_ch=4, out_ch=8, 16x16.
    N, Cin, H, W = 2, 4, 16, 16
    Cout, K = 8, 5

    key = jax.random.PRNGKey(0)
    kx, kw_, kb = jax.random.split(key, 3)
    x = jax.random.normal(kx, (N, Cin, H, W), dtype=jnp.float32)
    fan_in = Cin * K * K
    bound = 1.0 / (fan_in ** 0.5)
    weight = jax.random.uniform(kw_, (Cout, Cin, K, K), jnp.float32, -bound, bound)
    bias = jax.random.uniform(kb, (Cout,), jnp.float32, -bound, bound)

    out = downscale_pallas(x, weight, bias, stride=2, act_slope=0.1)
    out = jax.block_until_ready(out)
    assert out.shape == (N, Cout, 8, 8), out.shape

    # Tight check: reference with the same bf16-rounded operands (kernel accumulates
    # in f32; remaining error = bf16 output rounding + summation order).
    xb = x.astype(jnp.bfloat16).astype(jnp.float32)
    wb = weight.astype(jnp.bfloat16).astype(jnp.float32)
    ref_b = downscale_reference(xb, wb, bias, stride=2, act_slope=0.1)
    err_b = float(jnp.max(jnp.abs(out - ref_b)))
    assert err_b < 2e-2, err_b

    # Sanity check vs. the pure-f32 reference (covers bf16 operand/output rounding).
    ref = downscale_reference(x, weight, bias, stride=2, act_slope=0.1)
    err = float(jnp.max(jnp.abs(out - ref)))
    assert err < 1e-1, err

    print("KERNEL_OK")
</pallas_src>

<mosaic_0001>
module attributes {stable_mosaic.version = 11 : i64} {
  func.func @_conv_act_kernel(%arg0: i32, %arg1: i32, %arg2: memref<1x4x64x36xbf16, #tpu.memory_space<vmem>>, %arg3: memref<4x36x128xbf16, #tpu.memory_space<vmem>>, %arg4: memref<1x128xf32, #tpu.memory_space<vmem>>, %arg5: memref<1x64x128xbf16, #tpu.memory_space<vmem>>) attributes {dimension_semantics = [#tpu.dimension_semantics<parallel>, #tpu.dimension_semantics<parallel>], iteration_bounds = array<i64: 2, 1>, scalar_prefetch = 0 : i64, scratch_operands = 0 : i64, tpu.core_type = #tpu.core_type<tc>, window_params = [{transform_indices = @transform_0, window_bounds = array<i64: 1, 4, 64, 36>}, {pipeline_mode = #tpu.pipeline_mode<synchronous>, transform_indices = @transform_1, window_bounds = array<i64: 4, 36, 128>}, {pipeline_mode = #tpu.pipeline_mode<synchronous>, transform_indices = @transform_2, window_bounds = array<i64: 1, 128>}, {transform_indices = @transform_3, window_bounds = array<i64: 1, 64, 128>}]} {
    %c0 = arith.constant 0 : index
    %c0_0 = arith.constant 0 : index
    %c0_1 = arith.constant 0 : index
    %c0_2 = arith.constant 0 : index
    %0 = vector.load %arg2[%c0, %c0_0, %c0_1, %c0_2] : memref<1x4x64x36xbf16, #tpu.memory_space<vmem>>, vector<1x1x64x36xbf16>
    %1 = vector.shape_cast %0 : vector<1x1x64x36xbf16> to vector<64x36xbf16>
    %c0_3 = arith.constant 0 : index
    %c0_4 = arith.constant 0 : index
    %c0_5 = arith.constant 0 : index
    %2 = vector.load %arg3[%c0_3, %c0_4, %c0_5] : memref<4x36x128xbf16, #tpu.memory_space<vmem>>, vector<1x36x128xbf16>
    %3 = vector.shape_cast %2 : vector<1x36x128xbf16> to vector<36x128xbf16>
    %cst = arith.constant dense<0.000000e+00> : vector<64x128xf32>
    %4 = tpu.matmul %1, %3, %cst {dimension_numbers = #tpu.dot_dimension_numbers<[1], [0], [0], [1], [0, 0, 1, 1], [], []>} : vector<64x36xbf16>, vector<36x128xbf16>, vector<64x128xf32> -> vector<64x128xf32>
    %c0_6 = arith.constant 0 : index
    %c1 = arith.constant 1 : index
    %c0_7 = arith.constant 0 : index
    %c0_8 = arith.constant 0 : index
    %5 = vector.load %arg2[%c0_6, %c1, %c0_7, %c0_8] : memref<1x4x64x36xbf16, #tpu.memory_space<vmem>>, vector<1x1x64x36xbf16>
    %6 = vector.shape_cast %5 : vector<1x1x64x36xbf16> to vector<64x36xbf16>
    %c1_9 = arith.constant 1 : index
    %c0_10 = arith.constant 0 : index
    %c0_11 = arith.constant 0 : index
    %7 = vector.load %arg3[%c1_9, %c0_10, %c0_11] : memref<4x36x128xbf16, #tpu.memory_space<vmem>>, vector<1x36x128xbf16>
    %8 = vector.shape_cast %7 : vector<1x36x128xbf16> to vector<36x128xbf16>
    %cst_12 = arith.constant dense<0.000000e+00> : vector<64x128xf32>
    %9 = tpu.matmul %6, %8, %cst_12 {dimension_numbers = #tpu.dot_dimension_numbers<[1], [0], [0], [1], [0, 0, 1, 1], [], []>} : vector<64x36xbf16>, vector<36x128xbf16>, vector<64x128xf32> -> vector<64x128xf32>
    %10 = arith.addf %4, %9 : vector<64x128xf32>
    %c0_13 = arith.constant 0 : index
    %c2 = arith.constant 2 : index
    %c0_14 = arith.constant 0 : index
    %c0_15 = arith.constant 0 : index
    %11 = vector.load %arg2[%c0_13, %c2, %c0_14, %c0_15] : memref<1x4x64x36xbf16, #tpu.memory_space<vmem>>, vector<1x1x64x36xbf16>
    %12 = vector.shape_cast %11 : vector<1x1x64x36xbf16> to vector<64x36xbf16>
    %c2_16 = arith.constant 2 : index
    %c0_17 = arith.constant 0 : index
    %c0_18 = arith.constant 0 : index
    %13 = vector.load %arg3[%c2_16, %c0_17, %c0_18] : memref<4x36x128xbf16, #tpu.memory_space<vmem>>, vector<1x36x128xbf16>
    %14 = vector.shape_cast %13 : vector<1x36x128xbf16> to vector<36x128xbf16>
    %cst_19 = arith.constant dense<0.000000e+00> : vector<64x128xf32>
    %15 = tpu.matmul %12, %14, %cst_19 {dimension_numbers = #tpu.dot_dimension_numbers<[1], [0], [0], [1], [0, 0, 1, 1], [], []>} : vector<64x36xbf16>, vector<36x128xbf16>, vector<64x128xf32> -> vector<64x128xf32>
    %16 = arith.addf %10, %15 : vector<64x128xf32>
    %c0_20 = arith.constant 0 : index
    %c3 = arith.constant 3 : index
    %c0_21 = arith.constant 0 : index
    %c0_22 = arith.constant 0 : index
    %17 = vector.load %arg2[%c0_20, %c3, %c0_21, %c0_22] : memref<1x4x64x36xbf16, #tpu.memory_space<vmem>>, vector<1x1x64x36xbf16>
    %18 = vector.shape_cast %17 : vector<1x1x64x36xbf16> to vector<64x36xbf16>
    %c3_23 = arith.constant 3 : index
    %c0_24 = arith.constant 0 : index
    %c0_25 = arith.constant 0 : index
    %19 = vector.load %arg3[%c3_23, %c0_24, %c0_25] : memref<4x36x128xbf16, #tpu.memory_space<vmem>>, vector<1x36x128xbf16>
    %20 = vector.shape_cast %19 : vector<1x36x128xbf16> to vector<36x128xbf16>
    %cst_26 = arith.constant dense<0.000000e+00> : vector<64x128xf32>
    %21 = tpu.matmul %18, %20, %cst_26 {dimension_numbers = #tpu.dot_dimension_numbers<[1], [0], [0], [1], [0, 0, 1, 1], [], []>} : vector<64x36xbf16>, vector<36x128xbf16>, vector<64x128xf32> -> vector<64x128xf32>
    %22 = arith.addf %16, %21 : vector<64x128xf32>
    %c0_27 = arith.constant 0 : index
    %c0_28 = arith.constant 0 : index
    %23 = vector.load %arg4[%c0_27, %c0_28] : memref<1x128xf32, #tpu.memory_space<vmem>>, vector<1x128xf32>
    %24 = vector.broadcast %23 : vector<1x128xf32> to vector<64x128xf32>
    %25 = arith.addf %22, %24 : vector<64x128xf32>
    %cst_29 = arith.constant 0.000000e+00 : f32
    %26 = vector.broadcast %cst_29 : f32 to vector<64x128xf32>
    %27 = arith.cmpf oge, %25, %26 : vector<64x128xf32>
    %cst_30 = arith.constant 1.000000e-01 : f32
    %28 = vector.broadcast %cst_30 : f32 to vector<64x128xf32>
    %29 = arith.mulf %28, %25 : vector<64x128xf32>
    %30 = arith.select %27, %25, %29 : vector<64x128xi1>, vector<64x128xf32>
    %31 = arith.truncf %30 : vector<64x128xf32> to vector<64x128xbf16>
    %c0_31 = arith.constant 0 : index
    %c0_32 = arith.constant 0 : index
    %c0_33 = arith.constant 0 : index
    %32 = vector.load %arg5[%c0_31, %c0_32, %c0_33] : memref<1x64x128xbf16, #tpu.memory_space<vmem>>, vector<1x64x128xbf16>
    %33 = vector.shape_cast %32 : vector<1x64x128xbf16> to vector<64x128xbf16>
    %34 = vector.shape_cast %31 : vector<64x128xbf16> to vector<1x64x128xbf16>
    tpu.vector_store %arg5[%c0_31, %c0_32, %c0_33], %34 {strides = array<i32>} : memref<1x64x128xbf16, #tpu.memory_space<vmem>>, vector<1x64x128xbf16>,
    return
  }
  func.func @transform_0(%arg0: i32, %arg1: i32) -> (i32, i32, i32, i32) {
    %c0_i32 = arith.constant 0 : i32
    %c0_i32_0 = arith.constant 0 : i32
    %c0_i32_1 = arith.constant 0 : i32
    return %arg0, %c0_i32, %arg1, %c0_i32_0 : i32, i32, i32, i32
  }
  func.func @transform_1(%arg0: i32, %arg1: i32) -> (i32, i32, i32) {
    %c0_i32 = arith.constant 0 : i32
    %c0_i32_0 = arith.constant 0 : i32
    %c0_i32_1 = arith.constant 0 : i32
    %c0_i32_2 = arith.constant 0 : i32
    return %c0_i32, %c0_i32_0, %c0_i32_1 : i32, i32, i32
  }
  func.func @transform_2(%arg0: i32, %arg1: i32) -> (i32, i32) {
    %c0_i32 = arith.constant 0 : i32
    %c0_i32_0 = arith.constant 0 : i32
    %c0_i32_1 = arith.constant 0 : i32
    return %c0_i32, %c0_i32_0 : i32, i32
  }
  func.func @transform_3(%arg0: i32, %arg1: i32) -> (i32, i32, i32) {
    %c0_i32 = arith.constant 0 : i32
    %c0_i32_0 = arith.constant 0 : i32
    return %arg0, %arg1, %c0_i32 : i32, i32, i32
  }
}

</mosaic_0001>

<bundles_post_ra>
// kernel: tpu_custom_call.1
= control target key start
LH: loop header
LB: loop body
LE: loop exit
PB: predicated region body
PF: predicated region fallthrough
CT: control target
= control target key end

     0   :  { %8 = vsyncpa [#allocation3], 0  ;;  %s1549_s0 = inlined_call_operand.vmem [shape: bf16[2,4,64,36], index: 0, kind: input, shape index: {}]   ;;  %s1550_s1 = inlined_call_operand.vmem [shape: bf16[4,36,128], index: 1, kind: input, shape index: {}]   ;;  %s1551_s2 = inlined_call_operand.vmem [shape: f32[1,128], index: 2, kind: input, shape index: {}]   ;;  %s1552_s3 = inlined_call_operand.hbm [shape: bf16[2,64,128], index: 3, kind: output, shape index: {}]  }
   0x1   :  { %10 = vsyncpa [#allocation3 + $0x1], 0  ;;  %s1349_s12 = smov 0   ;;  %s1351_s13 = smov 0  }
   0x2   :  { %s1353_s14 = smov 0   ;;  %s1355_s15 = smov 0  }
   0x3   :  { %s1357_s16 = smov 0   ;;  %s1359_s17 = smov 0  }
   0x4 LB: > { %s911_s18 = sadd.s32 4294967295, %s1324_s17   ;;  %s912_s19 = sadd.s32 4294967294, %s1324_s17   ;;  %s1324_s17 = sphi %s1359_s17, %s16_s17   ;;  %s1320_s16 = sphi %s1357_s16, %s1559_s16   ;;  %s1316_s15 = sphi %s1355_s15, %s1558_s15   ;;  %s1312_s14 = sphi %s1353_s14, %s1557_s14   ;;  %s1308_s13 = sphi %s1351_s13, %s1556_s13   ;;  %s1304_s12 = sphi %s1349_s12, %s1555_s12  }
   0x5   : > { %s28_s20 = sadd.s32 1, %s1320_s16  ;;  %s107_s21 = sadd.s32 1, %s1312_s14 }
   0x6   : > { %p30_p0 = scmp.ge.s32.totalorder %s28_s20, 2  ;;  %p117_p1 = scmp.ne.s32.totalorder %s1312_s14, %s1308_s13 }
   0x7   : > { %p118_p2 = scmp.eq.s32.totalorder %s911_s18, 1  ;;  %p123_p3 = scmp.ne.s32.totalorder %s1308_s13, %s1304_s12 }
   0x8   : > { %s1561_s20 = smov (%p30_p0, %s28_s20), 0  ;;  %p124_p5 = scmp.eq.s32.totalorder %s912_s19, 1 }
   0x9   : > { %p1389_p4 = por %p118_p2, %p117_p1  ;;  %s102_s23 = ssub.s32 %s1320_s16, %s1561_s20 }
   0xa   : > { %p915_p6 = scmp.ge.s32.totalorder %s1324_s17, 1  ;;  %p105_p7 = scmp.eq.s32.totalorder %s102_s23, 0 }
   0xb   : > { %p1396_p8 = por %p124_p5, %p123_p3  ;;  %p161_p9 = scmp.lt.s32.totalorder %s1324_s17, 3 }
   0xc   : > { %s1402_s25 = scalar_select %p105_p7, %s1312_s14, %s107_s21  }
   0xd   : > { %p162_p10 = pnand %p915_p6, %p161_p9 }
   0xe   : > { %v1218_v0 = vld [vmem:[%s1550_s1 + $0x14] sm:$0xff] (!%p162_p10)   ;;  %v1219_v1 = vld [vmem:[%s1550_s1 + $0x28] sm:$0xff] (!%p162_p10)   ;;  %p190_p11 = scmp.lt.s32.totalorder (!%p162_p10), %s1316_s15, 1  ;;  %v1220_v2 = vld [vmem:[%s1550_s1 + $0x1c] sm:$0xff] (!%p162_p10)   ;;  %vm277_vm0 = vcmask (!%p162_p10), 1041408   ;;  %vm264_vm1 = vcmask (!%p162_p10), 293888  }
   0xf   : > { %165 = sbr.rel (%p162_p10) target bundleno = 292 (0x124), region = 32  ;;  %1077 = vmatprep.subr.bf16.mxu1 (!%p162_p10), %v1218_v0  ;;  %1105 = vmatprep.subr.bf16.mxu0 (!%p162_p10), %v1219_v1  ;;  %v1221_v3 = vld [vmem:[%s1550_s1 + $0x30] sm:$0xff] (!%p162_p10)   ;;  %v1222_v4 = vld [vmem:[%s1550_s1 + $0x24] ss:$0 sps:$4 sm:$0x33] (!%p162_p10)   ;;  %v1229_v8 = vld [vmem:[%s1550_s1 + $0x3c] sm:$0xff] (!%p162_p10)  }
  0x10   : > { %1078 = vmatpush3.bf16.msra.mxu1 (!%p162_p10), %v1218_v0  ;;  %1106 = vmatpush3.bf16.msra.mxu0 (!%p162_p10), %v1219_v1  ;;  %v1223_v5 = vld [vmem:[%s1550_s1 + $0x38] ss:$0 sps:$4 sm:$0x33] (!%p162_p10)   ;;  %v1227_v6 = vld [vmem:[%s1550_s1] sm:$0xff] (!%p162_p10)   ;;  %v279_v9 = vsel (!%p162_p10), %vm277_vm0, %v1222_v4, 0  ;;  %v1230_v14 = vld [vmem:[%s1550_s1 + $0x8] sm:$0xff] (!%p162_p10)  }
  0x11   : > { %1079 = vmatprep.subr.bf16.mxu1 (!%p162_p10), %v1220_v2  ;;  %1107 = vmatprep.subr.bf16.mxu0 (!%p162_p10), %v1221_v3  ;;  %v524_v11 = vsel (!%p162_p10), %vm277_vm0, %v1223_v5, 0  ;;  %v1231_v15 = vld [vmem:[%s1550_s1 + $0x44] sm:$0xff] (!%p162_p10)   ;;  %v1236_v19 = vld [vmem:[%s1550_s1 + $0x10] ss:$0 sps:$4 sm:$0x33] (!%p162_p10)   ;;  %s186_s19 = sand.u32 (!%p162_p10), 1, %s1308_s13  }
  0x12   : > { %v1237_v21 = vld [vmem:[%s1550_s1 + $0x4c] ss:$0 sps:$4 sm:$0x33] (!%p162_p10)   ;;  %v394_v22 = vsel (!%p162_p10), %vm277_vm0, %v1236_v19, 0  ;;  %v1002_v34 = vld [vmem:[%s1551_s2] ss:$0 sm:$0xff] (!%p162_p10) }
  0x13   : > { %v662_v24 = vsel (!%p162_p10), %vm277_vm0, %v1237_v21, 0  ;;  %s916_s21 = sshll.u32 (!%p162_p10), %s186_s19, 5  ;;  %s1025_s26 = sshll.u32 (!%p162_p10), %s1316_s15, 9 }
  0x14   : > { %1080 = vmatpush3.bf16.msra.mxu1 (!%p162_p10), %v1220_v2  ;;  %1108 = vmatpush3.bf16.msra.mxu0 (!%p162_p10), %v1221_v3  ;;  %s1497_s30 = scalar_lea.hbm (!%p162_p10), %s1552_s3, %s1025_s26  ;;  %s1326_s5 = smov (!%p162_p10), [#allocation2]  }
  0x15   : > { %1157 = vmatprep.subr.msk.bf16.mxu1 (!%p162_p10), %vm277_vm0, %v1222_v4  ;;  %1159 = vmatprep.subr.msk.bf16.mxu0 (!%p162_p10), %vm277_vm0, %v1223_v5  ;;  %s1250_s6 = sshll.u32 (!%p162_p10), %s1326_s5, 4  ;;  %s1251_s6 = int_to_ptr.vmem [resolvable:$false] %s1250_s6 }
  0x16   : > { %s191_s7 = scalar_select %p190_p11, %s1316_s15, 1 }
  0x17   : > { %s1503_s15 = scalar_lea.sflag [#allocation3], %s186_s19 }
  0x18   : > { %s1016_s18 = sshll.u32 %s191_s7, 7  ;;  %1082 = vmatpush3.bf16.msra.mxu1 %v279_v9  ;;  %1110 = vmatpush3.bf16.msra.mxu0 %v524_v11  ;;  %s1252_s7 = scalar_lea.vmem %s1251_s6, 1024 }
  0x19   : > { %s1427_s23 = scalar_lea.vmem %s1549_s0, %s1016_s18  ;;  %1091 = vmatprep.subr.bf16.mxu1 %v1227_v6  ;;  %1119 = vmatprep.subr.bf16.mxu0 %v1229_v8 }
  0x1a   : > { %v1224_v7 = vld [vmem:[%s1427_s23 + $0x20] sm:$0xff]   ;;  %v1226_v12 = vld [vmem:[%s1427_s23 + $0x28] sm:$0xff]   ;;  %v1232_v16 = vld [vmem:[%s1427_s23 + $0x30] sm:$0xff]  }
  0x1b   : > { %v1225_v10 = vld [vmem:[%s1427_s23 + $0x40] sm:$0xff]   ;;  %1083 = vmatprep.mubr.msk.bf16.mxu1 %vm264_vm1, %v1224_v7  ;;  %v1228_v13 = vld [vmem:[%s1427_s23 + $0x48] sm:$0xff]   ;;  %v1233_v17 = vld [vmem:[%s1427_s23 + $0x50] sm:$0xff]  }
  0x1c   : > { %1111 = vmatprep.mubr.msk.bf16.mxu0 %vm264_vm1, %v1225_v10  ;;  %1084 = vmatmul.mubr.msk.bf16.vlgmr.msra.gmra.mrb[0].mxu1 %vm264_vm1, %v1226_v12  ;;  %v1234_v18 = vld [vmem:[%s1427_s23 + $0x38] sm:$0xff]   ;;  %v1238_v23 = vld [vmem:[%s1427_s23] sm:$0xff]   ;;  %v1240_v26 = vld [vmem:[%s1427_s23 + $0x8] sm:$0xff]  }
  0x1d   : > { %1112 = vmatmul.mubr.msk.bf16.vlgmr.msra.gmra.mrb[0].mxu0 %vm264_vm1, %v1228_v13  ;;  %1092 = vmatpush3.bf16.msra.mxu1 %v1227_v6  ;;  %v1235_v20 = vld [vmem:[%s1427_s23 + $0x58] sm:$0xff]   ;;  %v1239_v25 = vld [vmem:[%s1427_s23 + $0x60] sm:$0xff]   ;;  %v1241_v27 = vld [vmem:[%s1427_s23 + $0x68] sm:$0xff]  }
  0x1e   : > { %1120 = vmatpush3.bf16.msra.mxu0 %v1229_v8  ;;  %1093 = vmatprep.subr.bf16.mxu1 %v1230_v14  ;;  %v1242_v28 = vld [vmem:[%s1427_s23 + $0x10] sm:$0xff]   ;;  %v1244_v30 = vld [vmem:[%s1427_s23 + $0x18] sm:$0xff]  }
  0x1f   : > { %1121 = vmatprep.subr.bf16.mxu0 %v1231_v15  ;;  %1087 = vmatprep.mubr.msk.bf16.mxu1 %vm264_vm1, %v1232_v16  ;;  %v1243_v29 = vld [vmem:[%s1427_s23 + $0x70] sm:$0xff]   ;;  %v1245_v31 = vld [vmem:[%s1427_s23 + $0x78] sm:$0xff]   ;;  %s188_s23 = scalar_lea.vmem [#allocation2], %s916_s21 }
  0x20   : > { %1115 = vmatprep.mubr.msk.bf16.mxu0 %vm264_vm1, %v1233_v17  ;;  %s832_s27 = sshll.u32 %s188_s23, 4  ;;  %s1499_s27 = int_to_ptr.vmem [resolvable:$true] %s832_s27 }
  0x21   : > { %1094 = vmatpush3.bf16.msra.mxu1 %v1230_v14  ;;  %s1246_s4 = scalar_lea.vmem %s1499_s27, 512  ;;  %p1253_p1 = scmp.lt.s32.totalorder %s1499_s27, %s1251_s6 }
  0x22   : > { %1122 = vmatpush3.bf16.msra.mxu0 %v1231_v15  ;;  %1158 = vmatprep.subr.msk.bf16.mxu1 %vm277_vm0, %v1236_v19  ;;  %p1247_p12 = scmp.ne.s32.totalorder %s1499_s27, %s1246_s4  ;;  %p1254_p2 = scmp.lt.s32.totalorder %s1252_s7, %s1246_s4 }
  0x23   : > { %1160 = vmatprep.subr.msk.bf16.mxu0 %vm277_vm0, %v1237_v21 }
  0x24   : > { %1088 = vmatmul.mubr.msk.bf16.gmra.mrb[4].mxu1 %vm264_vm1, %v1234_v18  ;;  %p1248_p13 = pnand %p1247_p12, %p1389_p4  ;;  %p1255_p3 = por %p1254_p2, %p1253_p1 }
  0x25   : > { %1116 = vmatmul.mubr.msk.bf16.gmra.mrb[4].mxu0 %vm264_vm1, %v1235_v20  ;;  %1096 = vmatpush3.bf16.msra.mxu1 %v394_v22 }
  0x26   : > { %1124 = vmatpush3.bf16.msra.mxu0 %v662_v24  ;;  %1097 = vmatprep.mubr.msk.bf16.mxu1 %vm264_vm1, %v1238_v23  ;;  %p1249_p0 = pneg %p1248_p13 }
  0x27   : > { %1125 = vmatprep.mubr.msk.bf16.mxu0 %vm264_vm1, %v1239_v25 }
  0x28   : > { %p1256_p5 = pnand %p1255_p3, %p1249_p0 }
  0x2c   : > { %1098 = vmatmul.mubr.msk.bf16.vlgmr.msra.gmra.mrb[0].mxu1 %vm264_vm1, %v1240_v26 }
  0x2d   : > { %1126 = vmatmul.mubr.msk.bf16.vlgmr.msra.gmra.mrb[0].mxu0 %vm264_vm1, %v1241_v27  ;;  %1101 = vmatprep.mubr.msk.bf16.mxu1 %vm264_vm1, %v1242_v28 }
  0x2e   : > { %1129 = vmatprep.mubr.msk.bf16.mxu0 %vm264_vm1, %v1243_v29 }
  0x34   : > { %1102 = vmatmul.mubr.msk.bf16.gmra.mrb[4].mxu1 %vm264_vm1, %v1244_v30 }
  0x35   : > { %1130 = vmatmul.mubr.msk.bf16.gmra.mrb[4].mxu0 %vm264_vm1, %v1245_v31 }
  0xff   : > { %v1099_v32 = vpop.f32.mrb[0].mxu1 }
 0x100   : > { %v1127_v33 = vpop.f32.mrb[0].mxu0  ;;  %v430_v35 = vpop.f32.mrb[1].mxu1 }
 0x101   : > { %v1133_v36 = vadd.f32 %v1127_v33, %v1099_v32  ;;  %v698_v37 = vpop.f32.mrb[1].mxu0  ;;  %v1100_v38 = vpop.f32.mrb[2].mxu1 }
 0x102   : > { %v1134_v39 = vadd.f32 %v698_v37, %v430_v35  ;;  %v1128_v40 = vpop.f32.mrb[2].mxu0  ;;  %v433_v41 = vpop.f32.mrb[3].mxu1 }
 0x103   : > { %v746_v42 = vadd.f32 %v1133_v36, %v1002_v34  ;;  %v1135_v43 = vadd.f32 %v1128_v40, %v1100_v38  ;;  %v701_v44 = vpop.f32.mrb[3].mxu0 }
 0x104   : > { %v744_v45 = vadd.f32 %v1134_v39, %v1002_v34  ;;  %v1136_v46 = vadd.f32 %v701_v44, %v433_v41 }
 0x105   : > { %v762_v47 = vmul.f32 0.1, %v746_v42  ;;  %v747_v48 = vadd.f32 %v1135_v43, %v1002_v34  ;;  %vm754_vm2 = vcmp.ge.f32.partialorder %v746_v42, 0.0 }
 0x106   : > { %v760_v49 = vmul.f32 0.1, %v744_v45  ;;  %v745_v50 = vadd.f32 %v1136_v46, %v1002_v34  ;;  %vm752_vm3 = vcmp.ge.f32.partialorder %v744_v45, 0.0 }
 0x107   : > { %vm755_vm4 = vcmp.ge.f32.partialorder %v747_v48, 0.0  ;;  %v763_v51 = vmul.f32 0.1, %v747_v48  ;;  %v1103_v52 = vpop.f32.mrb[4].mxu1  ;;  %v770_v56 = vsel %vm754_vm2, %v746_v42, %v762_v47 }
 0x108   : > { %vm753_vm5 = vcmp.ge.f32.partialorder %v745_v50, 0.0  ;;  %v761_v53 = vmul.f32 0.1, %v745_v50  ;;  %v1131_v54 = vpop.f32.mrb[4].mxu0  ;;  %v446_v55 = vpop.f32.mrb[5].mxu1  ;;  %v768_v61 = vsel %vm752_vm3, %v744_v45, %v760_v49 }
 0x109   : > { %v771_v57 = vsel %vm755_vm4, %v747_v48, %v763_v51  ;;  %v1137_v58 = vadd.f32 %v1131_v54, %v1103_v52  ;;  %v714_v59 = vpop.f32.mrb[5].mxu0  ;;  %v1104_v60 = vpop.f32.mrb[6].mxu1 }
 0x10a   : > { %v1034_v62 = vpack.c.bf16 %v771_v57, %v770_v56  ;;  %v769_v63 = vsel %vm753_vm5, %v745_v50, %v761_v53  ;;  %v1138_v0 = vadd.f32 %v714_v59, %v446_v55  ;;  %v1132_v1 = vpop.f32.mrb[6].mxu0  ;;  %v449_v2 = vpop.f32.mrb[7].mxu1 }
 0x10b   : > { %v1029_v3 = vpack.c.bf16 %v769_v63, %v768_v61  ;;  %v750_v4 = vadd.f32 %v1137_v58, %v1002_v34  ;;  %v1139_v5 = vadd.f32 %v1132_v1, %v1104_v60  ;;  %v717_v6 = vpop.f32.mrb[7].mxu0 }
 0x10c   : > { %1046 = vst [vmem:[%s188_s23 + $0x8] sm:$0xff] %v1034_v62   ;;  %v748_v7 = vadd.f32 %v1138_v0, %v1002_v34  ;;  %v1140_v8 = vadd.f32 %v717_v6, %v449_v2 }
 0x10d   : > { %1030 = vst [vmem:[%s188_s23] sm:$0xff] %v1029_v3   ;;  %v766_v9 = vmul.f32 0.1, %v750_v4  ;;  %v751_v10 = vadd.f32 %v1139_v5, %v1002_v34  ;;  %vm758_vm6 = vcmp.ge.f32.partialorder %v750_v4, 0.0 }
 0x10e   : > { %v764_v11 = vmul.f32 0.1, %v748_v7  ;;  %v749_v12 = vadd.f32 %v1140_v8, %v1002_v34  ;;  %vm756_vm7 = vcmp.ge.f32.partialorder %v748_v7, 0.0 }
 0x10f   : > { %vm759_vm8 = vcmp.ge.f32.partialorder %v751_v10, 0.0  ;;  %v767_v13 = vmul.f32 0.1, %v751_v10  ;;  %v774_v15 = vsel %vm758_vm6, %v750_v4, %v766_v9 }
 0x110   : > { %vm757_vm9 = vcmp.ge.f32.partialorder %v749_v12, 0.0  ;;  %v765_v14 = vmul.f32 0.1, %v749_v12  ;;  %v772_v17 = vsel %vm756_vm7, %v748_v7, %v764_v11 }
 0x111   : > { %v775_v16 = vsel %vm759_vm8, %v751_v10, %v767_v13 }
 0x112   : > { %v1044_v18 = vpack.c.bf16 %v775_v16, %v774_v15  ;;  %v773_v19 = vsel %vm757_vm9, %v749_v12, %v765_v14 }
 0x113   : > { %v1039_v20 = vpack.c.bf16 %v773_v19, %v772_v17 }
 0x114   : > { %1048 = vst [vmem:[%s188_s23 + $0x18] sm:$0xff] %v1044_v18  }
 0x115   : > { %1047 = vst [vmem:[%s188_s23 + $0x10] sm:$0xff] %v1039_v20  }
 0x116   : > { %1259 = shalt.err (!%p1256_p5)
}
 0x117   : > { %s1260_s8 = scalar_lea.hbm %s1497_s30, 512  ;;  %s1264_s11 = scalar_lea.hbm %s1552_s3, 1024 }
 0x118   : > { %p1261_p6 = scmp.ne.s32.totalorder %s1497_s30, %s1260_s8  ;;  %p1265_p10 = scmp.lt.u32.totalorder %s1497_s30, %s1552_s3 }
 0x119   : > { %p1266_p11 = scmp.lt.u32.totalorder %s1264_s11, %s1260_s8  ;;  %p1268_p13 = scmp.lt.u32.totalorder %s1260_s8, %s1497_s30 }
 0x11a   : > { %p1262_p7 = pnand %p1261_p6, %p1389_p4 }
 0x11b   : > { %p1267_p12 = por %p1266_p11, %p1265_p10 }
 0x11c   : > { %p1263_p9 = pneg %p1262_p7 }
 0x11d   : > { %p1269_p0 = por %p1268_p13, %p1267_p12 }
 0x11f   : > { %p1270_p1 = pnand %p1269_p0, %p1263_p9 }
 0x121   : > { %1273 = shalt.err (!%p1270_p1)
}
 0x122   : > { %s1327_s21 = smov 64   ;;  %s1328_s23 = smov 4  }
 0x123   : > { %1161 = dma.vmem_to_hbm [thread:$0]  (%p1389_p4), %s1499_s27, 512, %s1497_s30, %s1503_s15, %s1327_s21, %s1327_s21, %s1328_s23  }
 0x124 PF: > { %p1167_p2 = scmp.ge.s32.totalorder %s1324_s17, 2  ;;  %s847_s26 = sand.u32 1, %s1304_s12  }
 0x125   : > { %s848_s28 = scalar_lea.sflag [#allocation3], %s847_s26 }
 0x126   : > { %p1164_p3 = pnand %p1167_p2, %p1396_p8 }
 0x128   : > { %1299 = dma.done.wait (!%p1164_p3), %s848_s28, 512  }
 0x129   : > { %1301 = vsyncadd (!%p1164_p3), %s848_s28, 4294966784  ;;  %s16_s17 = sadd.s32 1, %s1324_s17   ;;  %s1555_s12 = smov %s1308_s13 }
 0x12a   : > { %p13_p5 = scmp.ge.s32.totalorder %s16_s17, 4   ;;  %s1556_s13 = smov %s1312_s14 }
 0x12b   : > { %s1557_s14 = smov %s1402_s25  ;;  %s1558_s15 = smov %s1320_s16 }
 0x12c   : > { %s1559_s16 = smov %s1561_s20  ;;  %15 = sbr.rel (!%p13_p5) target bundleno = 4 (0x4), region = 73 }
 0x133   :  { %853 = vsyncpa [#allocation3], 1 }
 0x134   :  { %855 = vsyncpa [#allocation3 + $0x1], 1 }

</bundles_post_ra>
